<compile_context>
chip_gen: v5e
topology: v5e:2x2
jax: 0.10.0
libtpu: 0.0.40
codegen_flags: <defaults>
</compile_context>

<pallas_src>
import jax
import jax.numpy as jnp
from jax.experimental import pallas as pl
from jax.experimental.pallas import tpu as pltpu

NUM_FEATURES = 8      # stands in for len(features)
H1, H2, OUT = 16, 8, 1
LANE = 128            # lane width of a vreg / last-dim tiling unit
BLOCK_B = 131072      # default batch tile (lanes); 64K-256K amortizes per-step overhead


def _mlp_kernel(x_ref, w1_ref, b1_ref, w2_ref, b2_ref, w3c_ref, b3_ref, o_ref):
    # Feature-major fused MLP on one batch tile (batch on the lane axis):
    #   h1 = relu(W1 @ x  + b1)   [H1, TB]   bf16 MXU operands, f32 accumulation
    #   h2 = relu(W2 @ h1 + b2)   [H2, TB]   bf16 MXU operands, f32 accumulation
    #   o  = sum_k w3[k] * h2[k]  [1,  TB]   f32 VPU mul + XLU sublane reduce
    xb = x_ref[...].astype(jnp.bfloat16)                                # [F, TB]
    h1 = jnp.dot(w1_ref[...].astype(jnp.bfloat16), xb,
                 preferred_element_type=jnp.float32) + b1_ref[...]
    h1 = jnp.maximum(h1, 0.0)                                           # [H1, TB] f32
    h2 = jnp.dot(w2_ref[...].astype(jnp.bfloat16), h1.astype(jnp.bfloat16),
                 preferred_element_type=jnp.float32) + b2_ref[...]
    h2 = jnp.maximum(h2, 0.0)                                           # [H2, TB] f32
    # Layer 3 (M=1, K=8): avoid a 1-row matmul (wasted MXU pass + MRF pop); the
    # sublane reduction goes to the XLU, a free slot next to the MXU/VPU work.
    h3 = jnp.sum(h2 * w3c_ref[...], axis=0, keepdims=True) + b3_ref[...]  # [1, TB]
    o_ref[...] = h3.astype(o_ref.dtype)


def financial_score_model_fm(xt, params, *, block_b=BLOCK_B):
    """Feature-major fast path.  xt: [F, B] float32 -> (B,) float32 scores.

    No wrapper-side transposes: the batch sits on the lane axis on the way in
    and the scores come back lane-dense.
    """
    w1, b1, w2, b2, w3, b3 = params
    f, bsz = xt.shape

    # Tiny parameter plumbing (negligible): biases as columns, fc3 weight as an
    # [H2, 1] column for the VPU/XLU formulation.
    b1c = b1.reshape(-1, 1)
    b2c = b2.reshape(-1, 1)
    b3c = b3.reshape(1, 1)
    w3c = jnp.transpose(w3)                                             # [H2, 1]

    # Batch tiling: lane-aligned, and >=2 tiles once the batch is big enough so
    # v7x's two TensorCores both get work via dimension_semantics=("parallel",).
    pb = pl.cdiv(bsz, LANE) * LANE
    if pb <= 2 * LANE:
        tb = pb
    else:
        half = pl.cdiv(pl.cdiv(pb, 2), LANE) * LANE
        tb = min(block_b, half)
    padded_b = pl.cdiv(pb, tb) * tb
    num_tiles = padded_b // tb

    if padded_b != bsz:
        xt = jnp.pad(xt, ((0, 0), (0, padded_b - bsz)))

    # Weights/biases: full array, same block every grid step -> DMA'd once,
    # VMEM-resident across the whole batch loop.
    # TODO(synk): optionally pack the six tiny params into one block; minor win,
    # mostly for small-batch / many-launch scenarios.
    const = lambda a: pl.BlockSpec(a.shape, lambda i: (0, 0))

    flops = 2 * padded_b * (f * H1 + H1 * H2 + H2 * OUT)
    bytes_accessed = 4 * padded_b * (f + OUT) + 4 * sum(int(p.size) for p in params)

    out = pl.pallas_call(
        _mlp_kernel,
        out_shape=jax.ShapeDtypeStruct((OUT, padded_b), jnp.float32),
        grid=(num_tiles,),
        in_specs=[
            # TODO(synk): sweep pipeline_mode=pl.Buffered(3) on this spec if the
            # bundle dump shows exposed DMA at large tile sizes.
            pl.BlockSpec((f, tb), lambda i: (0, i)),
            const(w1), const(b1c),
            const(w2), const(b2c),
            const(w3c), const(b3c),
        ],
        out_specs=pl.BlockSpec((OUT, tb), lambda i: (0, i)),
        compiler_params=pltpu.CompilerParams(
            dimension_semantics=("parallel",),      # shard batch tiles across TCs (v7x)
            vmem_limit_bytes=48 * 1024 * 1024,      # < v7x 64 MiB physical; needed on v5e
        ),
        cost_estimate=pl.CostEstimate(
            flops=flops, transcendentals=0, bytes_accessed=bytes_accessed
        ),
    )(xt, w1, b1c, w2, b2c, w3c, b3c)                                   # [1, padded_b]

    return out[0, :bsz]                                                 # (B,) lane-dense


def financial_score_model(x, params, *, block_b=BLOCK_B):
    """PyTorch-convention entry: x [B, F] float32 -> [B, 1] float32.

    NOTE: for peak bandwidth, store/produce x feature-major [F, B] upstream and
    call financial_score_model_fm directly -- the transpose here is an extra HBM
    pass over a lane-padded [B, 8] layout, and the final [B, 1] reshape re-adds
    the padded output layout the kernel deliberately avoids.
    """
    scores = financial_score_model_fm(jnp.transpose(x), params, block_b=block_b)
    return scores[:, None]


def init_params(key):
    """Deterministic synthetic params with exact PyTorch nn.Linear shapes:
    weight [out, in], bias [out]."""
    ks = jax.random.split(key, 6)

    def lin(kw, kb, fan_in, fan_out):
        bound = float(fan_in) ** -0.5
        w = jax.random.uniform(kw, (fan_out, fan_in), jnp.float32, -bound, bound)
        b = jax.random.uniform(kb, (fan_out,), jnp.float32, -bound, bound)
        return w, b

    w1, b1 = lin(ks[0], ks[1], NUM_FEATURES, H1)
    w2, b2 = lin(ks[2], ks[3], H1, H2)
    w3, b3 = lin(ks[4], ks[5], H2, OUT)
    return (w1, b1, w2, b2, w3, b3)


def reference(x, params):
    """Plain-JAX f32 reference in the PyTorch (batch-major) convention."""
    w1, b1, w2, b2, w3, b3 = params
    h = jnp.maximum(x @ w1.T + b1, 0.0)
    h = jnp.maximum(h @ w2.T + b2, 0.0)
    return h @ w3.T + b3


if __name__ == "__main__":
    key = jax.random.PRNGKey(0)
    kx1, kx2, kp = jax.random.split(key, 3)
    params = init_params(kp)

    # bf16 MXU operands (f32 accumulation) => compare against the f32 reference
    # with a loosened tolerance; typical error is ~1e-2.
    ATOL = RTOL = 7.5e-2

    # Small batch (single 128-lane tile) through the PyTorch-convention shim.
    B1 = 8
    x1 = jax.random.normal(kx1, (B1, NUM_FEATURES), jnp.float32)
    out1 = jax.block_until_ready(financial_score_model(x1, params))
    ref1 = reference(x1, params)
    assert out1.shape == (B1, 1)
    assert jnp.allclose(out1, ref1, atol=ATOL, rtol=RTOL)

    # Larger batch through the feature-major fast path with a small block_b to
    # exercise the multi-tile "parallel" grid (3 tiles) + tail padding.
    B2 = 300
    x2 = jax.random.normal(kx2, (B2, NUM_FEATURES), jnp.float32)
    scores2 = jax.block_until_ready(
        financial_score_model_fm(jnp.transpose(x2), params, block_b=128)
    )
    ref2 = reference(x2, params)[:, 0]
    assert scores2.shape == (B2,)
    assert jnp.allclose(scores2, ref2, atol=ATOL, rtol=RTOL)

    print("KERNEL_OK")
</pallas_src>

<mosaic_0001>
module attributes {stable_mosaic.version = 11 : i64} {
  func.func @_mlp_kernel(%arg0: i32, %arg1: memref<8x128xf32, #tpu.memory_space<vmem>>, %arg2: memref<16x8xf32, #tpu.memory_space<vmem>>, %arg3: memref<16x1xf32, #tpu.memory_space<vmem>>, %arg4: memref<8x16xf32, #tpu.memory_space<vmem>>, %arg5: memref<8x1xf32, #tpu.memory_space<vmem>>, %arg6: memref<8x1xf32, #tpu.memory_space<vmem>>, %arg7: memref<1x1xf32, #tpu.memory_space<vmem>>, %arg8: memref<1x128xf32, #tpu.memory_space<vmem>>) attributes {dimension_semantics = [#tpu.dimension_semantics<parallel>], iteration_bounds = array<i64: 1>, scalar_prefetch = 0 : i64, scratch_operands = 0 : i64, tpu.core_type = #tpu.core_type<tc>, window_params = [{transform_indices = @transform_0, window_bounds = array<i64: 8, 128>}, {pipeline_mode = #tpu.pipeline_mode<synchronous>, transform_indices = @transform_1, window_bounds = array<i64: 16, 8>}, {pipeline_mode = #tpu.pipeline_mode<synchronous>, transform_indices = @transform_2, window_bounds = array<i64: 16, 1>}, {pipeline_mode = #tpu.pipeline_mode<synchronous>, transform_indices = @transform_3, window_bounds = array<i64: 8, 16>}, {pipeline_mode = #tpu.pipeline_mode<synchronous>, transform_indices = @transform_4, window_bounds = array<i64: 8, 1>}, {pipeline_mode = #tpu.pipeline_mode<synchronous>, transform_indices = @transform_5, window_bounds = array<i64: 8, 1>}, {pipeline_mode = #tpu.pipeline_mode<synchronous>, transform_indices = @transform_6, window_bounds = array<i64: 1, 1>}, {transform_indices = @transform_7, window_bounds = array<i64: 1, 128>}]} {
    %c0 = arith.constant 0 : index
    %c0_0 = arith.constant 0 : index
    %0 = vector.load %arg1[%c0, %c0_0] : memref<8x128xf32, #tpu.memory_space<vmem>>, vector<8x128xf32>
    %1 = arith.truncf %0 : vector<8x128xf32> to vector<8x128xbf16>
    %c0_1 = arith.constant 0 : index
    %c0_2 = arith.constant 0 : index
    %2 = vector.load %arg2[%c0_1, %c0_2] : memref<16x8xf32, #tpu.memory_space<vmem>>, vector<16x8xf32>
    %3 = arith.truncf %2 : vector<16x8xf32> to vector<16x8xbf16>
    %cst = arith.constant dense<0.000000e+00> : vector<16x128xf32>
    %4 = tpu.matmul %3, %1, %cst {dimension_numbers = #tpu.dot_dimension_numbers<[1], [0], [0], [1], [0, 0, 1, 1], [], []>} : vector<16x8xbf16>, vector<8x128xbf16>, vector<16x128xf32> -> vector<16x128xf32>
    %c0_3 = arith.constant 0 : index
    %c0_4 = arith.constant 0 : index
    %5 = vector.load %arg3[%c0_3, %c0_4] : memref<16x1xf32, #tpu.memory_space<vmem>>, vector<16x1xf32>
    %6 = vector.broadcast %5 : vector<16x1xf32> to vector<16x128xf32>
    %7 = arith.addf %4, %6 : vector<16x128xf32>
    %cst_5 = arith.constant 0.000000e+00 : f32
    %8 = vector.broadcast %cst_5 : f32 to vector<16x128xf32>
    %9 = arith.maximumf %7, %8 : vector<16x128xf32>
    %c0_6 = arith.constant 0 : index
    %c0_7 = arith.constant 0 : index
    %10 = vector.load %arg4[%c0_6, %c0_7] : memref<8x16xf32, #tpu.memory_space<vmem>>, vector<8x16xf32>
    %11 = arith.truncf %10 : vector<8x16xf32> to vector<8x16xbf16>
    %12 = arith.truncf %9 : vector<16x128xf32> to vector<16x128xbf16>
    %cst_8 = arith.constant dense<0.000000e+00> : vector<8x128xf32>
    %13 = tpu.matmul %11, %12, %cst_8 {dimension_numbers = #tpu.dot_dimension_numbers<[1], [0], [0], [1], [0, 0, 1, 1], [], []>} : vector<8x16xbf16>, vector<16x128xbf16>, vector<8x128xf32> -> vector<8x128xf32>
    %c0_9 = arith.constant 0 : index
    %c0_10 = arith.constant 0 : index
    %14 = vector.load %arg5[%c0_9, %c0_10] : memref<8x1xf32, #tpu.memory_space<vmem>>, vector<8x1xf32>
    %15 = vector.broadcast %14 : vector<8x1xf32> to vector<8x128xf32>
    %16 = arith.addf %13, %15 : vector<8x128xf32>
    %cst_11 = arith.constant 0.000000e+00 : f32
    %17 = vector.broadcast %cst_11 : f32 to vector<8x128xf32>
    %18 = arith.maximumf %16, %17 : vector<8x128xf32>
    %c0_12 = arith.constant 0 : index
    %c0_13 = arith.constant 0 : index
    %19 = vector.load %arg6[%c0_12, %c0_13] : memref<8x1xf32, #tpu.memory_space<vmem>>, vector<8x1xf32>
    %20 = vector.broadcast %19 : vector<8x1xf32> to vector<8x128xf32>
    %21 = arith.mulf %18, %20 : vector<8x128xf32>
    %cst_14 = arith.constant dense<0.000000e+00> : vector<128xf32>
    %22 = vector.multi_reduction <add>, %21, %cst_14 [0] : vector<8x128xf32> to vector<128xf32>
    %23 = vector.shape_cast %22 : vector<128xf32> to vector<1x128xf32>
    %c0_15 = arith.constant 0 : index
    %c0_16 = arith.constant 0 : index
    %24 = vector.load %arg7[%c0_15, %c0_16] : memref<1x1xf32, #tpu.memory_space<vmem>>, vector<1x1xf32>
    %25 = vector.broadcast %24 : vector<1x1xf32> to vector<1x128xf32>
    %26 = arith.addf %23, %25 : vector<1x128xf32>
    %c0_17 = arith.constant 0 : index
    %c0_18 = arith.constant 0 : index
    %27 = vector.load %arg8[%c0_17, %c0_18] : memref<1x128xf32, #tpu.memory_space<vmem>>, vector<1x128xf32>
    tpu.vector_store %arg8[%c0_17, %c0_18], %26 {strides = array<i32>} : memref<1x128xf32, #tpu.memory_space<vmem>>, vector<1x128xf32>,
    return
  }
  func.func @transform_0(%arg0: i32) -> (i32, i32) {
    %c0_i32 = arith.constant 0 : i32
    %c0_i32_0 = arith.constant 0 : i32
    return %c0_i32, %arg0 : i32, i32
  }
  func.func @transform_1(%arg0: i32) -> (i32, i32) {
    %c0_i32 = arith.constant 0 : i32
    %c0_i32_0 = arith.constant 0 : i32
    %c0_i32_1 = arith.constant 0 : i32
    return %c0_i32, %c0_i32_0 : i32, i32
  }
  func.func @transform_2(%arg0: i32) -> (i32, i32) {
    %c0_i32 = arith.constant 0 : i32
    %c0_i32_0 = arith.constant 0 : i32
    %c0_i32_1 = arith.constant 0 : i32
    return %c0_i32, %c0_i32_0 : i32, i32
  }
  func.func @transform_3(%arg0: i32) -> (i32, i32) {
    %c0_i32 = arith.constant 0 : i32
    %c0_i32_0 = arith.constant 0 : i32
    %c0_i32_1 = arith.constant 0 : i32
    return %c0_i32, %c0_i32_0 : i32, i32
  }
  func.func @transform_4(%arg0: i32) -> (i32, i32) {
    %c0_i32 = arith.constant 0 : i32
    %c0_i32_0 = arith.constant 0 : i32
    %c0_i32_1 = arith.constant 0 : i32
    return %c0_i32, %c0_i32_0 : i32, i32
  }
  func.func @transform_5(%arg0: i32) -> (i32, i32) {
    %c0_i32 = arith.constant 0 : i32
    %c0_i32_0 = arith.constant 0 : i32
    %c0_i32_1 = arith.constant 0 : i32
    return %c0_i32, %c0_i32_0 : i32, i32
  }
  func.func @transform_6(%arg0: i32) -> (i32, i32) {
    %c0_i32 = arith.constant 0 : i32
    %c0_i32_0 = arith.constant 0 : i32
    %c0_i32_1 = arith.constant 0 : i32
    return %c0_i32, %c0_i32_0 : i32, i32
  }
  func.func @transform_7(%arg0: i32) -> (i32, i32) {
    %c0_i32 = arith.constant 0 : i32
    %c0_i32_0 = arith.constant 0 : i32
    return %c0_i32, %arg0 : i32, i32
  }
}

</mosaic_0001>

<bundles_post_ra>
// kernel: tpu_custom_call.1
= control target key start
LH: loop header
LB: loop body
LE: loop exit
PB: predicated region body
PF: predicated region fallthrough
CT: control target
= control target key end

     0   :  { %s241_s0 = inlined_call_operand.vmem [shape: f32[8,128], index: 0, kind: input, shape index: {}]   ;;  %s242_s1 = inlined_call_operand.vmem [shape: f32[16,8], index: 1, kind: input, shape index: {}]   ;;  %s243_s2 = inlined_call_operand.vmem [shape: f32[16,1], index: 2, kind: input, shape index: {}]   ;;  %s244_s3 = inlined_call_operand.vmem [shape: f32[8,16], index: 3, kind: input, shape index: {}]   ;;  %s245_s4 = inlined_call_operand.vmem [shape: f32[8,1], index: 4, kind: input, shape index: {}]   ;;  %s246_s5 = inlined_call_operand.vmem [shape: f32[8,1], index: 5, kind: input, shape index: {}]   ;;  %s247_s6 = inlined_call_operand.<no memory space> [shape: f32[1,1], index: 6, kind: input, shape index: {}]   ;;  %s248_s7 = inlined_call_operand.hbm [shape: f32[1,128], index: 7, kind: output, shape index: {}]  }
   0x1   :  { %v12_v0 = vstv %s247_s6 }
   0x2   :  { %13 = vst [vmem:[#allocation2] sm:$0x1] %v12_v0 }
   0x3   :  { %v30_v1 = vld [vmem:[%s241_s0] sm:$0xff]  ;;  %vm51_vm0 = vcmask 1043456   ;;  %v33_v3 = vld [vmem:[%s242_s1 + $0x8] sm:$0xff]  ;;  %v169_v5 = vmov 0  }
   0x4   :  { %v32_v2 = vld [vmem:[%s242_s1] sm:$0xff]  ;;  %v31_v4 = vpack.c.bf16 %v30_v1, %v30_v1  ;;  %140 = vset.pattern.permute.xlu0 %v169_v5  ;;  %141 = vset.pattern.permute.xlu1 %v169_v5 }
   0x5   :  { %v35_v6 = vld [vmem:[%s243_s2] sm:$0xff] }
   0x6   :  { %14 = vsyncpa [#allocation4], 0  ;;  %39 = vperm.xlu0 %140, %v35_v6   ;;  %142 = vset.pattern.permute.xlu2 %v169_v5  ;;  %v53_v7 = vsel %vm51_vm0, %v31_v4, 0  ;;  %v34_v8 = vpack.c.bf16 %v33_v3, %v32_v2  ;;  %vm47_vm1 = vcmask 64512   ;;  %v36_v9 = vld [vmem:[%s243_s2 + $0x8] sm:$0xff]  ;;  %v74_v10 = vld [vmem:[%s245_s4] sm:$0xff] }
   0x7   :  { %62 = vmatpush.bf16.msra.mxu0 %v53_v7  ;;  %77 = vperm.xlu1 %141, %v74_v10   ;;  %v98_v12 = vld [vmem:[%s246_s5] sm:$0xff]  ;;  %vm80_vm2 = vcmask 130048   ;;  %s127_s16 = sshll.u32 %s248_s7, 4  ;;  %s128_s16 = int_to_ptr.hbm [resolvable:$true] %s127_s16 }
   0x8   :  { %v71_v21 = vld [vmem:[%s244_s3] sm:$0xff]  ;;  %s170_s3 = smov [#allocation3]  }
   0x9   :  { %v111_v11 = vld [vmem:[#allocation2] sm:$0x1]  ;;  %v72_v23 = vpack.c.bf16 %v71_v21, %v71_v21  ;;  %s125_s4 = sshll.u32 %s170_s3, 4  ;;  %s126_s4 = int_to_ptr.vmem [resolvable:$true] %s125_s4 }
   0xa   :  { %136 = vmatmul.msk.bf16.vlgmr.msra.gmra.mxu0 %vm47_vm1, %v34_v8  ;;  %114 = vperm.xlu2 %142, %v111_v11  }
   0xe   :  { %44 = vperm.xlu0 %140, %v36_v9  }
   0xf   :  { %101 = vperm.xlu1 %141, %v98_v12  }
  0x64   :  { %v115_v34 = vpop.permute.xlu2 %114 }
  0x65   :  { %v117_v37 = vperm.slane %v115_v34, 0 }
  0x78   :  { %v40_v13 = vpop.permute.xlu0 %39 }
  0x79   :  { %v78_v24 = vpop.permute.xlu1 %77 }
  0x80   :  { %v45_v16 = vpop.permute.xlu0 %44 }
  0x81   :  { %v102_v28 = vpop.permute.xlu1 %101 }
  0x87   :  { %v64_v14 = vpop.f32.mrf.mxu0 }
  0x88   :  { %v65_v15 = vadd.f32 %v64_v14, %v40_v13 }
  0x8a   :  { %v69_v19 = vmax.f32 %v65_v15, 0.0 }
  0x8f   :  { %v66_v17 = vpop.f32.mrf.mxu0 }
  0x90   :  { %v67_v18 = vadd.f32 %v66_v17, %v45_v16 }
  0x92   :  { %v70_v20 = vmax.f32 %v67_v18, 0.0 }
  0x94   :  { %v73_v22 = vpack.c.bf16 %v70_v20, %v69_v19 }
  0x96   :  { %91 = vmatpush.bf16.msra.mxu1 %v73_v22 }
  0x99   :  { %137 = vmatmul.msk.bf16.vlgmr.msra.gmra.mxu1 %vm80_vm2, %v72_v23 }
 0x116   :  { %v93_v25 = vpop.f32.mrf.mxu1 }
 0x117   :  { %v94_v26 = vadd.f32 %v93_v25, %v78_v24 }
 0x119   :  { %v97_v27 = vmax.f32 %v94_v26, 0.0 }
 0x11b   :  { %v104_v29 = vmul.f32 %v102_v28, %v97_v27 }
 0x11d   :  { %v105_v30 = vrot.slane %v104_v29, 4 }
 0x11e   :  { %v95_v31 = vpop.f32.mrf.mxu1 }
 0x11f   :  { %v106_v32 = vadd.f32 %v105_v30, %v104_v29 }
 0x121   :  { %v107_v33 = vrot.slane %v106_v32, 2 }
 0x123   :  { %v108_v35 = vadd.f32 %v107_v33, %v106_v32 }
 0x125   :  { %v109_v36 = vrot.slane %v108_v35, 1 }
 0x127   :  { %v110_v38 = vadd.f32 %v109_v36, %v108_v35 }
 0x129   :  { %v118_v39 = vadd.f32 %v117_v37, %v110_v38 }
 0x12b   :  { %119 = vst [vmem:[#allocation3] sm:$0x1] %v118_v39 }
 0x12c   :  { %130 = dma.vmem_to_hbm [thread:$0]  %s126_s4, 16, %s128_s16, [#allocation4]  }
 0x12d   :  { %167 = dma.done.wait [#allocation4], 16  }
 0x12e   :  { %168 = vsyncadd [#allocation4], 4294967280 }
 0x12f   :  { %135 = vsyncpa [#allocation4], 1 }

</bundles_post_ra>
